<compile_context>
chip_gen: v6e
topology: v6e:2x2x1
jax: 0.10.0
libtpu: 0.0.40
codegen_flags: <defaults>
</compile_context>

<pallas_src>
import jax
import jax.numpy as jnp
from jax.experimental import pallas as pl
from jax.experimental.pallas import tpu as pltpu


def _chomp_copy_kernel(x_ref, o_ref):
    # Tiled path: in/out blocks are identical -> the slice below is the
    # identity and this is a plain full-block copy.
    # Fallback path (tiny l_out): static prefix slice of the length axis.
    o_ref[...] = x_ref[:, : o_ref.shape[-1]]


def _round_down(x: int, m: int) -> int:
    return (x // m) * m


def _round_up(x: int, m: int) -> int:
    return ((x + m - 1) // m) * m


def _vmem_capacity_bytes() -> int:
    """Per-core VMEM capacity; conservative (v7x) fallback if unavailable."""
    try:
        cap = getattr(pltpu.get_tpu_info(), "vmem_capacity_bytes", None)
        if cap:
            return int(cap)
    except Exception:
        pass
    return 64 * 1024 * 1024


def chomp1d(x: jax.Array, chomp_size: int) -> jax.Array:
    """Pallas equivalent of Chomp1d(chomp_size)(x) for x of shape (N, C, L)."""
    n, c, l = x.shape
    l_out = l - chomp_size
    assert l_out > 0, "chomp_size must be < L"

    rows = n * c
    x2 = x.reshape(rows, l)  # collapse batch*channels onto the sublane axis

    # Sublane packing per dtype: f32 -> 8, bf16/f16 -> 16, int8/fp8 -> 32.
    itemsize = jnp.dtype(x.dtype).itemsize
    sublane = {4: 8, 2: 16, 1: 32}.get(itemsize, 8)

    # --- Generation-aware budgets -------------------------------------------
    vmem_cap = _vmem_capacity_bytes()
    # ~4 MiB blocks on v7x (64 MiB VMEM), ~8 MiB on v5e/v6e (128 MiB VMEM).
    block_budget = max(1 << 20, vmem_cap // 16)
    # 4 buffers (2 operands x double-buffer) * block_budget = vmem_cap/4,
    # comfortably under the scoped limit below on every generation.
    vmem_limit = min(vmem_cap // 2, 64 * 1024 * 1024)

    # --- Lane (length) tiling: ~8 KiB of bytes per row, multiple of 128 -----
    lane_cap = max(128, _round_down(8192 // itemsize, 128))
    if l_out >= 128:
        tile_l_out = min(lane_cap, _round_down(l_out, 128))
        tile_l_in = tile_l_out      # identical blocks: chomped tail never read
        tiled = True
    else:
        # Tiny length: full-extent blocks (always legal), slice in-kernel.
        tile_l_out = l_out
        tile_l_in = l
        tiled = False

    # --- Row (sublane) tiling from the per-block byte budget ----------------
    if rows >= sublane:
        row_budget = max(sublane, block_budget // (tile_l_in * itemsize))
        tile_r = min(_round_down(row_budget, sublane),
                     _round_down(rows, sublane))
        tile_r = max(tile_r, sublane)
    else:
        tile_r = rows               # full extent -> always legal

    grid_r = pl.cdiv(rows, tile_r)
    grid_l = pl.cdiv(l_out, tile_l_out)

    # --- v7x megacore balance ------------------------------------------------
    # Ensure an even (>= 2) block count when an axis collapsed to one block,
    # so the two TensorCores split the copy evenly. Both splits stay within
    # the byte budget (they only shrink the block). Harmless on v5e/v6e.
    if (grid_r * grid_l) % 2 == 1:
        if grid_r == 1 and rows >= 2 * sublane:
            tile_r = _round_up(pl.cdiv(rows, 2), sublane)
            grid_r = pl.cdiv(rows, tile_r)
        elif grid_l == 1 and tiled and l_out >= 2 * 128:
            tile_l_out = max(128, _round_down(pl.cdiv(l_out, 2), 128))
            tile_l_in = tile_l_out
            grid_l = pl.cdiv(l_out, tile_l_out)

    grid = (grid_r, grid_l)

    out2 = pl.pallas_call(
        _chomp_copy_kernel,
        out_shape=jax.ShapeDtypeStruct((rows, l_out), x.dtype),
        grid_spec=pltpu.PrefetchScalarGridSpec(
            num_scalar_prefetch=0,
            grid=grid,
            in_specs=[
                pl.BlockSpec((tile_r, tile_l_in), lambda i, j: (i, j)),
            ],
            out_specs=pl.BlockSpec((tile_r, tile_l_out), lambda i, j: (i, j)),
        ),
        compiler_params=pltpu.CompilerParams(
            # Pure data movement; both axes independent -> megacore sharding
            # on v7x, harmless on v5e/v6e. Default double-buffering kept.
            dimension_semantics=("parallel", "parallel"),
            vmem_limit_bytes=vmem_limit,
        ),
        # Advisory 1R+1W HBM traffic so XLA can schedule neighbors around a
        # known mem-bound custom call.
        cost_estimate=pl.CostEstimate(
            flops=0,
            transcendentals=0,
            bytes_accessed=2 * rows * l_out * itemsize,
        ),
    )(x2)

    return out2.reshape(n, c, l_out)


if __name__ == "__main__":
    key = jax.random.PRNGKey(0)

    # Case 1: small shapes matching the original PyTorch test harness
    # (exercises the tiny-shape full-extent fallback path).
    x1 = jax.random.normal(key, (2, 4, 16), dtype=jnp.float32)
    o1 = jax.block_until_ready(chomp1d(x1, 3))
    assert o1.shape == (2, 4, 13), o1.shape
    assert jnp.allclose(o1, x1[:, :, :-3]), "mismatch (small case)"

    # Case 2: lane-aligned length axis (tiled path + megacore row split).
    k2 = jax.random.fold_in(key, 1)
    x2 = jax.random.normal(k2, (2, 8, 1027), dtype=jnp.float32)
    o2 = jax.block_until_ready(chomp1d(x2, 3))
    assert o2.shape == (2, 8, 1024), o2.shape
    assert jnp.allclose(o2, x2[:, :, :-3]), "mismatch (aligned case)"

    # Case 3: ragged boundary tiles on both axes (rows=15, l_out=293) —
    # exercises padded reads + masked stores on the final tiles.
    k3 = jax.random.fold_in(key, 2)
    x3 = jax.random.normal(k3, (3, 5, 300), dtype=jnp.float32)
    o3 = jax.block_until_ready(chomp1d(x3, 7))
    assert o3.shape == (3, 5, 293), o3.shape
    assert jnp.allclose(o3, x3[:, :, :-7]), "mismatch (ragged case)"

    # Case 4: bf16 — exercises the dtype-aware (bytes-based) tile sizing.
    k4 = jax.random.fold_in(key, 3)
    x4 = jax.random.normal(k4, (2, 16, 515), dtype=jnp.bfloat16)
    o4 = jax.block_until_ready(chomp1d(x4, 3))
    assert o4.shape == (2, 16, 512), o4.shape
    assert jnp.array_equal(o4, x4[:, :, :-3]), "mismatch (bf16 case)"

    print("KERNEL_OK")
</pallas_src>

<mosaic_0001>
module attributes {stable_mosaic.version = 11 : i64} {
  func.func @_chomp_copy_kernel(%arg0: i32, %arg1: i32, %arg2: memref<8x16xf32, #tpu.memory_space<vmem>>, %arg3: memref<8x13xf32, #tpu.memory_space<vmem>>) attributes {dimension_semantics = [#tpu.dimension_semantics<parallel>, #tpu.dimension_semantics<parallel>], iteration_bounds = array<i64: 1, 1>, scalar_prefetch = 0 : i64, scratch_operands = 0 : i64, tpu.core_type = #tpu.core_type<tc>, window_params = [{transform_indices = @transform_0, window_bounds = array<i64: 8, 16>}, {transform_indices = @transform_1, window_bounds = array<i64: 8, 13>}]} {
    %c0 = arith.constant 0 : index
    %c0_0 = arith.constant 0 : index
    %0 = vector.load %arg2[%c0, %c0_0] : memref<8x16xf32, #tpu.memory_space<vmem>>, vector<8x13xf32>
    %c0_1 = arith.constant 0 : index
    %c0_2 = arith.constant 0 : index
    %1 = vector.load %arg3[%c0_1, %c0_2] : memref<8x13xf32, #tpu.memory_space<vmem>>, vector<8x13xf32>
    tpu.vector_store %arg3[%c0_1, %c0_2], %0 {strides = array<i32>} : memref<8x13xf32, #tpu.memory_space<vmem>>, vector<8x13xf32>,
    return
  }
  func.func @transform_0(%arg0: i32, %arg1: i32) -> (i32, i32) {
    %c0_i32 = arith.constant 0 : i32
    return %arg0, %arg1 : i32, i32
  }
  func.func @transform_1(%arg0: i32, %arg1: i32) -> (i32, i32) {
    %c0_i32 = arith.constant 0 : i32
    return %arg0, %arg1 : i32, i32
  }
}

</mosaic_0001>

<bundles_post_ra>
// kernel: tpu_custom_call.1
= control target key start
LH: loop header
LB: loop body
LE: loop exit
PB: predicated region body
PF: predicated region fallthrough
CT: control target
= control target key end

     0   :  { %6 = vsyncpa [#allocation3], 0  ;;  %s103_s0 = inlined_call_operand.hbm [shape: f32[8,16], index: 0, kind: input, shape index: {}]   ;;  %s104_s1 = inlined_call_operand.hbm [shape: f32[8,13], index: 1, kind: output, shape index: {}]  }
   0x1   :  { %7 = vsyncpa [#allocation4], 0  ;;  %s85_s6 = smov [#allocation2]  }
   0x2   :  { %s14_s7 = sshll.u32 %s85_s6, 4  ;;  %s15_s7 = int_to_ptr.vmem [resolvable:$true] %s14_s7 }
   0x3   :  { %s49_s8 = scalar_lea.vmem %s15_s7, 128  ;;  %p54_p1 = scmp.lt.s32.totalorder %s15_s7, %s15_s7 }
   0x4   :  { %p50_p0 = scmp.ne.s32.totalorder %s15_s7, %s49_s8  ;;  %p55_p2 = scmp.lt.s32.totalorder %s49_s8, %s49_s8 }
   0x6   :  { %p56_p3 = por %p55_p2, %p54_p1 }
   0x8   :  { %p57_p4 = pnand %p56_p3, %p50_p0 }
   0xa   :  { %60 = shalt.err (!%p57_p4)
}
   0xb   :  { %17 = dma.hbm_to_vmem [thread:$0]  %s103_s0, 128, %s15_s7, [#allocation3]  }
   0xc   :  { %81 = dma.done.wait [#allocation3], 128  }
   0xd   :  { %82 = vsyncadd [#allocation3], 4294967168  ;;  %s86_s11 = smov [#allocation5]   ;;  %vm22_vm0 = vcmask 105472   ;;  %v21_v0 = vld [vmem:[#allocation2] sm:$0xff] }
   0xe   :  { %s30_s12 = sshll.u32 %s86_s11, 4  ;;  %23 = vst.msk [vmem:[#allocation5] sm:$0xff] %vm22_vm0, %v21_v0  ;;  %s31_s12 = int_to_ptr.vmem [resolvable:$true] %s30_s12 }
   0xf   :  { %s61_s13 = scalar_lea.vmem %s31_s12, 128  ;;  %p66_p6 = scmp.lt.s32.totalorder %s31_s12, %s31_s12 }
  0x10   :  { %p62_p5 = scmp.ne.s32.totalorder %s31_s12, %s61_s13  ;;  %p67_p7 = scmp.lt.s32.totalorder %s61_s13, %s61_s13 }
  0x12   :  { %p68_p8 = por %p67_p7, %p66_p6 }
  0x14   :  { %p69_p9 = pnand %p68_p8, %p62_p5 }
  0x16   :  { %72 = shalt.err (!%p69_p9)
}
  0x17   :  { %33 = dma.vmem_to_hbm [thread:$0]  %s31_s12, 128, %s104_s1, [#allocation4]  }
  0x18   :  { %83 = dma.done.wait [#allocation4], 128  }
  0x19   :  { %84 = vsyncadd [#allocation4], 4294967168 }
  0x1a   :  { %37 = vsyncpa [#allocation3], 1 }
  0x1b   :  { %38 = vsyncpa [#allocation4], 1 }

</bundles_post_ra>
